<compile_context>
chip_gen: v7x
topology: tpu7x:2x2x1
jax: 0.10.0
libtpu: 0.0.40
codegen_flags: <defaults>
</compile_context>

<pallas_src>
import functools
import math

import jax
import jax.numpy as jnp
from jax.experimental import pallas as pl
from jax.experimental.pallas import tpu as pltpu


def _round_up(a, b):
    return (a + b - 1) // b * b


def _sublane_pack(dtype):
    isz = jnp.dtype(dtype).itemsize
    return {4: 8, 2: 16, 1: 32}.get(isz, 8)


def _pick_tile(dim, unit, cap):
    """Largest multiple of `unit` that divides `dim` and is <= cap."""
    assert dim % unit == 0, (dim, unit)
    q = dim // unit
    cap_q = max(1, cap // unit)
    best = 1
    d = 1
    while d * d <= q:
        if q % d == 0:
            if d <= cap_q:
                best = max(best, d)
            if (q // d) <= cap_q:
                best = max(best, q // d)
        d += 1
    return best * unit


@functools.lru_cache(maxsize=1)
def _is_v7x():
    # v7x has 64 MiB VMEM per TensorCore (v5e/v6e: 128 MiB). Be conservative
    # (assume the smaller VMEM) if detection fails.
    try:
        kind = jax.devices()[0].device_kind.lower()
        return ("v7" in kind) or ("7x" in kind) or ("tpu7" in kind)
    except Exception:  # pragma: no cover - defensive
        return True


# ----------------------------------------------------------------------------
# Kernels
# ----------------------------------------------------------------------------
def _linear_kernel_acc(x_ref, w_ref, b_ref, o_ref, acc_ref):
    """K-tiled path: f32 accumulator resident across the (arbitrary) K axis."""
    k = pl.program_id(2)

    @pl.when(k == 0)
    def _():
        acc_ref[...] = jnp.zeros_like(acc_ref)

    acc_ref[...] += jnp.dot(
        x_ref[...], w_ref[...], preferred_element_type=jnp.float32
    )

    @pl.when(k == pl.num_programs(2) - 1)
    def _():
        o_ref[...] = (
            acc_ref[...] + b_ref[...].astype(jnp.float32)
        ).astype(o_ref.dtype)


def _linear_kernel_single(x_ref, w_ref, b_ref, o_ref):
    """Fast path when K fits in one tile: dot + bias straight to the output."""
    o_ref[...] = (
        jnp.dot(x_ref[...], w_ref[...], preferred_element_type=jnp.float32)
        + b_ref[...].astype(jnp.float32)
    ).astype(o_ref.dtype)


# ----------------------------------------------------------------------------
# Forward wrapper
# ----------------------------------------------------------------------------
def linear_pallas(x, params):
    """y = x @ W^T + b (nn.Linear semantics).

    params come from init_linear_params: weight stored pre-transposed and
    pre-padded (Kp, Np), bias pre-padded (1, Np). No per-call weight copies.
    """
    weight_t = params["weight_t"]          # (Kp, Np)
    bias2d = params["bias"]                # (1, Np)
    K = params["in_features"]
    N = params["out_features"]

    *lead, Kx = x.shape
    assert Kx == K, (Kx, K)
    Kp, Np = weight_t.shape
    M = int(math.prod(lead)) if lead else 1

    out_dtype = x.dtype
    x_isz = jnp.dtype(x.dtype).itemsize
    w_isz = jnp.dtype(weight_t.dtype).itemsize
    b_isz = jnp.dtype(bias2d.dtype).itemsize
    o_isz = jnp.dtype(out_dtype).itemsize

    v7x = _is_v7x()
    vmem_budget = (48 << 20) if v7x else (96 << 20)

    # ---- dtype / generation aware tile caps --------------------------------
    mpack = _sublane_pack(x.dtype)
    wide = max(w_isz, x_isz) <= 2          # bf16 / int8: stream wider panels
    tm_cap = 512
    tn_cap = (1024 if wide else 512) * (1 if v7x else 2)
    tk_cap = (2048 if wide else 1024) * (1 if v7x else 2)

    # ---- M tiling -----------------------------------------------------------
    Mp = _round_up(M, mpack)
    tm = _pick_tile(Mp, mpack, tm_cap)
    if Mp > tm_cap and tm < tm_cap // 2:
        # Poor factorization of Mp: pad a little more, keep full-width tiles.
        tm = tm_cap
        Mp = _round_up(M, tm)

    # ---- N tiling (Np is a multiple of 128 by construction at init) --------
    tn = _pick_tile(Np, 128, tn_cap)

    # ---- K tiling -----------------------------------------------------------
    if Kp % 128 == 0:
        tk = _pick_tile(Kp, 128, tk_cap)
    else:
        tk = Kp                            # small ragged K: one full-extent tile

    # Keep >=2 output blocks for big problems so both v7x TensorCores get work.
    if (Mp // tm) * (Np // tn) == 1 and Mp * Np * o_isz >= (1 << 20):
        if Np >= 256:
            tn = _pick_tile(Np, 128, max(128, tn // 2))
        elif Mp >= 2 * mpack:
            tm = _pick_tile(Mp, mpack, max(mpack, tm // 2))

    grid_m, grid_n, grid_k = Mp // tm, Np // tn, Kp // tk

    # ---- pad activations only when unavoidable ------------------------------
    x2d = x.reshape(M, K)
    if (Mp, Kp) != (M, K):
        # Zero-padded K columns meet zero-padded weight rows -> contribute 0.
        x2d = jnp.pad(x2d, ((0, Mp - M), (0, Kp - K)))

    # ---- weight-panel buffering / VMEM budget -------------------------------
    small_m = Mp <= 64
    w_bufs = 3 if (small_m and grid_k >= 2) else 2

    def _footprint(wb):
        f = (2 * tm * tk * x_isz + wb * tk * tn * w_isz
             + 2 * tm * tn * o_isz + 2 * tn * b_isz)
        if grid_k > 1:
            f += tm * tn * 4               # f32 accumulator scratch
        return f

    if _footprint(w_bufs) > (vmem_budget * 3) // 4:
        w_bufs = 2
    vmem_limit = int(min(max(_footprint(w_bufs) + (8 << 20), 16 << 20),
                         vmem_budget))

    # ---- truthful cost estimate (panel re-read factors included) ------------
    cost = pl.CostEstimate(
        flops=2 * Mp * Np * Kp,
        transcendentals=0,
        bytes_accessed=int(
            grid_n * Mp * Kp * x_isz       # x panel read once per N block
            + grid_m * Kp * Np * w_isz     # w panel read once per M block
            + grid_m * Np * b_isz
            + Mp * Np * o_isz
        ),
    )

    def _build(deep_w):
        if grid_k == 1:
            grid_spec = pltpu.PrefetchScalarGridSpec(
                num_scalar_prefetch=0,
                grid=(grid_m, grid_n),
                in_specs=[
                    pl.BlockSpec((tm, tk), lambda i, j: (i, 0)),
                    pl.BlockSpec((tk, tn), lambda i, j: (0, j)),
                    pl.BlockSpec((1, tn), lambda i, j: (0, j)),
                ],
                out_specs=pl.BlockSpec((tm, tn), lambda i, j: (i, j)),
            )
            kernel = _linear_kernel_single
            dims = ("parallel", "parallel")
        else:
            if deep_w:
                # Small-M / weight-streaming-bound: 3-deep weight pipeline.
                w_spec = pl.BlockSpec((tk, tn), lambda i, j, k: (k, j),
                                      pipeline_mode=pl.Buffered(3))
            else:
                w_spec = pl.BlockSpec((tk, tn), lambda i, j, k: (k, j))
            grid_spec = pltpu.PrefetchScalarGridSpec(
                num_scalar_prefetch=0,
                grid=(grid_m, grid_n, grid_k),
                in_specs=[
                    pl.BlockSpec((tm, tk), lambda i, j, k: (i, k)),
                    w_spec,
                    pl.BlockSpec((1, tn), lambda i, j, k: (0, j)),
                ],
                out_specs=pl.BlockSpec((tm, tn), lambda i, j, k: (i, j)),
                scratch_shapes=[pltpu.VMEM((tm, tn), jnp.float32)],
            )
            kernel = _linear_kernel_acc
            dims = ("parallel", "parallel", "arbitrary")

        return pl.pallas_call(
            kernel,
            out_shape=jax.ShapeDtypeStruct((Mp, Np), out_dtype),
            grid_spec=grid_spec,
            compiler_params=pltpu.CompilerParams(
                dimension_semantics=dims,
                vmem_limit_bytes=vmem_limit,
            ),
            cost_estimate=cost,
        )

    try:
        out = _build(w_bufs == 3)(x2d, weight_t, bias2d)
    except Exception:
        if w_bufs != 3:
            raise
        # Deep weight buffering unavailable on this build: default 2-deep.
        out = _build(False)(x2d, weight_t, bias2d)

    if (Mp, Np) != (M, N):
        out = out[:M, :N]
    return out.reshape(*lead, N)


# ----------------------------------------------------------------------------
# Parameter init (xavier_uniform_ weight, zero bias) — padding done ONCE here
# ----------------------------------------------------------------------------
def init_linear_params(key, in_features, out_features, dtype=jnp.float32):
    bound = math.sqrt(6.0 / (in_features + out_features))
    weight = jax.random.uniform(
        key, (out_features, in_features), dtype=jnp.float32,
        minval=-bound, maxval=bound,
    ).astype(dtype)
    weight_t = jnp.asarray(weight.T)                  # (K, N)

    K = in_features
    Np = _round_up(out_features, 128)
    # Pad K only when it is ragged AND too large for a single full-extent
    # K tile; small ragged K is handled in-kernel with tk == K (no padding).
    if K % 128 == 0 or K <= 2048:
        Kp = K
    else:
        Kp = _round_up(K, 128)
    if (Kp, Np) != (K, out_features):
        weight_t = jnp.pad(weight_t, ((0, Kp - K), (0, Np - out_features)))
    bias = jnp.zeros((1, Np), dtype=dtype)

    return {
        "weight_t": weight_t,       # (Kp, Np), zero-padded
        "bias": bias,               # (1, Np), zero-padded
        "in_features": in_features,
        "out_features": out_features,
    }


if __name__ == "__main__":
    key = jax.random.PRNGKey(0)
    k1, k2, k3, k4, kw1, kw2, kw3, kw4 = jax.random.split(key, 8)

    # Case 1: small, nicely shaped (batch=2, seq=8, in=32, out=64) — fast path.
    x1 = jax.random.normal(k1, (2, 8, 32), dtype=jnp.float32)
    p1 = init_linear_params(kw1, 32, 64)
    y1 = jax.block_until_ready(linear_pallas(x1, p1))
    ref1 = x1 @ p1["weight_t"][:32, :64] + p1["bias"][0, :64]
    assert y1.shape == (2, 8, 64)
    assert jnp.allclose(y1, ref1, atol=1e-4), "mismatch vs reference (case 1)"

    # Case 2: ragged K/N — single full-extent K tile, no per-call weight pad.
    x2 = jax.random.normal(k2, (3, 7, 200), dtype=jnp.float32)
    p2 = init_linear_params(kw2, 200, 160)
    y2 = jax.block_until_ready(linear_pallas(x2, p2))
    ref2 = x2 @ p2["weight_t"][:200, :160] + p2["bias"][0, :160]
    assert y2.shape == (3, 7, 160)
    assert jnp.allclose(y2, ref2, atol=1e-3), "mismatch vs reference (case 2)"

    # Case 3: small-M, deep-K — exercises the K-resident f32 accumulator and
    # deeper weight-panel buffering.
    x3 = jax.random.normal(k3, (2, 4, 2560), dtype=jnp.float32)
    p3 = init_linear_params(kw3, 2560, 512)
    y3 = jax.block_until_ready(linear_pallas(x3, p3))
    ref3 = x3 @ p3["weight_t"][:2560, :512] + p3["bias"][0, :512]
    assert y3.shape == (2, 4, 512)
    assert jnp.allclose(y3, ref3, rtol=2e-2, atol=2e-2), "mismatch (case 3)"

    # Case 4: bf16 params/activations (MXU-friendly), f32 in-kernel accumulate.
    x4 = jax.random.normal(k4, (2, 16, 256), dtype=jnp.float32).astype(jnp.bfloat16)
    p4 = init_linear_params(kw4, 256, 384, dtype=jnp.bfloat16)
    y4 = jax.block_until_ready(linear_pallas(x4, p4))
    ref4 = (x4.astype(jnp.float32)
            @ p4["weight_t"][:256, :384].astype(jnp.float32)
            + p4["bias"][0, :384].astype(jnp.float32))
    assert y4.shape == (2, 16, 384)
    assert jnp.allclose(y4.astype(jnp.float32), ref4, rtol=2e-2, atol=2e-2), \
        "mismatch vs reference (case 4)"

    print("KERNEL_OK")
</pallas_src>

<mosaic_0001>
module attributes {stable_mosaic.version = 11 : i64} {
  func.func @_linear_kernel_single(%arg0: i32, %arg1: i32, %arg2: memref<16x32xf32, #tpu.memory_space<vmem>>, %arg3: memref<32x128xf32, #tpu.memory_space<vmem>>, %arg4: memref<1x128xf32, #tpu.memory_space<vmem>>, %arg5: memref<16x128xf32, #tpu.memory_space<vmem>>) attributes {dimension_semantics = [#tpu.dimension_semantics<parallel>, #tpu.dimension_semantics<parallel>], iteration_bounds = array<i64: 1, 1>, scalar_prefetch = 0 : i64, scratch_operands = 0 : i64, tpu.core_type = #tpu.core_type<tc>, window_params = [{transform_indices = @transform_0, window_bounds = array<i64: 16, 32>}, {transform_indices = @transform_1, window_bounds = array<i64: 32, 128>}, {transform_indices = @transform_2, window_bounds = array<i64: 1, 128>}, {transform_indices = @transform_3, window_bounds = array<i64: 16, 128>}]} {
    %c0 = arith.constant 0 : index
    %c0_0 = arith.constant 0 : index
    %0 = vector.load %arg2[%c0, %c0_0] : memref<16x32xf32, #tpu.memory_space<vmem>>, vector<16x32xf32>
    %c0_1 = arith.constant 0 : index
    %c0_2 = arith.constant 0 : index
    %1 = vector.load %arg3[%c0_1, %c0_2] : memref<32x128xf32, #tpu.memory_space<vmem>>, vector<32x128xf32>
    %cst = arith.constant dense<0.000000e+00> : vector<16x128xf32>
    %2 = tpu.matmul %0, %1, %cst {dimension_numbers = #tpu.dot_dimension_numbers<[1], [0], [0], [1], [0, 0, 1, 1], [], []>} : vector<16x32xf32>, vector<32x128xf32>, vector<16x128xf32> -> vector<16x128xf32>
    %c0_3 = arith.constant 0 : index
    %c0_4 = arith.constant 0 : index
    %3 = vector.load %arg4[%c0_3, %c0_4] : memref<1x128xf32, #tpu.memory_space<vmem>>, vector<1x128xf32>
    %4 = vector.broadcast %3 : vector<1x128xf32> to vector<16x128xf32>
    %5 = arith.addf %2, %4 : vector<16x128xf32>
    %c0_5 = arith.constant 0 : index
    %c0_6 = arith.constant 0 : index
    %6 = vector.load %arg5[%c0_5, %c0_6] : memref<16x128xf32, #tpu.memory_space<vmem>>, vector<16x128xf32>
    tpu.vector_store %arg5[%c0_5, %c0_6], %5 {strides = array<i32>} : memref<16x128xf32, #tpu.memory_space<vmem>>, vector<16x128xf32>,
    return
  }
  func.func @transform_0(%arg0: i32, %arg1: i32) -> (i32, i32) {
    %c0_i32 = arith.constant 0 : i32
    %c0_i32_0 = arith.constant 0 : i32
    return %arg0, %c0_i32 : i32, i32
  }
  func.func @transform_1(%arg0: i32, %arg1: i32) -> (i32, i32) {
    %c0_i32 = arith.constant 0 : i32
    %c0_i32_0 = arith.constant 0 : i32
    return %c0_i32, %arg1 : i32, i32
  }
  func.func @transform_2(%arg0: i32, %arg1: i32) -> (i32, i32) {
    %c0_i32 = arith.constant 0 : i32
    %c0_i32_0 = arith.constant 0 : i32
    return %c0_i32, %arg1 : i32, i32
  }
  func.func @transform_3(%arg0: i32, %arg1: i32) -> (i32, i32) {
    %c0_i32 = arith.constant 0 : i32
    return %arg0, %arg1 : i32, i32
  }
}

</mosaic_0001>

<bundles_post_ra>
// kernel: tpu_custom_call.1
= control target key start
LH: loop header
LB: loop body
LE: loop exit
PB: predicated region body
PF: predicated region fallthrough
CT: control target
= control target key end

     0   :  { %8 = vsyncpa [#allocation3], 0  ;;  %s336_s0 = inlined_call_operand.hbm [shape: f32[16,32], index: 0, kind: input, shape index: {}]   ;;  %s337_s1 = inlined_call_operand.hbm [shape: f32[32,128], index: 1, kind: input, shape index: {}]   ;;  %s338_s2 = inlined_call_operand.vmem [shape: f32[1,128], index: 2, kind: input, shape index: {}]   ;;  %s339_s3 = inlined_call_operand.hbm [shape: f32[16,128], index: 3, kind: output, shape index: {}]  }
   0x1   :  { %9 = vsyncpa [#allocation6], 0 }
   0x2   :  { %10 = vsyncpa [#allocation4], 0  ;;  %s263_s12 = smov [#allocation2]   ;;  %s191_s16 = scalar_lea.hbm %s336_s0, 256 }
   0x3   :  { %s16_s13 = sshll.u32 %s263_s12, 4  ;;  %p192_p0 = scmp.ne.s32.totalorder %s336_s0, %s191_s16  ;;  %s17_s13 = int_to_ptr.vmem [resolvable:$true] %s16_s13 }
   0x4   :  { %p195_p1 = scmp.lt.u32.totalorder %s191_s16, %s336_s0 }
   0x6   :  { %p197_p2 = pnand %p195_p1, %p192_p0 }
   0x8   :  { %200 = shalt.err (!%p197_p2)
}
   0x9   :  { %s201_s21 = scalar_lea.vmem %s17_s13, 256  ;;  %p206_p4 = scmp.lt.s32.totalorder %s17_s13, %s17_s13 }
   0xa   :  { %p202_p3 = scmp.ne.s32.totalorder %s17_s13, %s201_s21  ;;  %p207_p5 = scmp.lt.s32.totalorder %s201_s21, %s201_s21 }
   0xc   :  { %p208_p6 = por %p207_p5, %p206_p4 }
   0xe   :  { %p209_p7 = pnand %p208_p6, %p202_p3 }
  0x10   :  { %212 = shalt.err (!%p209_p7)
}
  0x11   :  { %s264_s22 = smov 128   ;;  %s265_s23 = smov 8  }
  0x12   :  { %22 = dma.hbm_to_vmem [thread:$0]  %s336_s0, 256, %s17_s13, [#allocation3], %s264_s22, %s264_s22, %s265_s23  }
  0x13   :  { %s266_s26 = smov [#allocation5]   ;;  %s213_s30 = scalar_lea.hbm %s337_s1, 512 }
  0x14   :  { %s28_s27 = sshll.u32 %s266_s26, 4  ;;  %p214_p8 = scmp.ne.s32.totalorder %s337_s1, %s213_s30  ;;  %s29_s27 = int_to_ptr.vmem [resolvable:$true] %s28_s27 }
  0x15   :  { %p217_p9 = scmp.lt.u32.totalorder %s213_s30, %s337_s1 }
  0x17   :  { %p219_p10 = pnand %p217_p9, %p214_p8 }
  0x19   :  { %222 = shalt.err (!%p219_p10)
}
  0x1a   :  { %s223_s8 = scalar_lea.vmem %s29_s27, 512  ;;  %p228_p12 = scmp.lt.s32.totalorder %s29_s27, %s29_s27 }
  0x1b   :  { %p224_p11 = scmp.ne.s32.totalorder %s29_s27, %s223_s8  ;;  %p229_p13 = scmp.lt.s32.totalorder %s223_s8, %s223_s8 }
  0x1d   :  { %p230_p0 = por %p229_p13, %p228_p12 }
  0x1f   :  { %p231_p1 = pnand %p230_p0, %p224_p11 }
  0x21   :  { %234 = shalt.err (!%p231_p1)
}
  0x22   :  { %34 = dma.hbm_to_vmem [thread:$0]  %s337_s1, 512, %s29_s27, [#allocation6], %s264_s22, %s264_s22, %s265_s23  }
  0x23   :  { %257 = dma.done.wait [#allocation3], 256  }
  0x24   :  { %258 = vsyncadd [#allocation3], 4294967040 }
  0x25   :  { %259 = dma.done.wait [#allocation6], 512  }
  0x26   :  { %260 = vsyncadd [#allocation6], 4294966784  ;;  %vm56_vm0 = vcmask 261120   ;;  %v45_v0 = vld [vmem:[#allocation5] sm:$0xff]  ;;  %v46_v1 = vld [vmem:[#allocation5 + $0x8] sm:$0xff]  ;;  %s267_s11 = smov [#allocation7]  }
  0x27   :  { %v47_v2 = vld [vmem:[#allocation5 + $0x10] sm:$0xff]  ;;  %v178_v3 = vpack.c.bf16 %v46_v1, %v45_v0  ;;  %v48_v4 = vld [vmem:[#allocation5 + $0x18] sm:$0xff]  ;;  %s145_s12 = sshll.u32 %s267_s11, 4  ;;  %s146_s12 = int_to_ptr.vmem [resolvable:$true] %s145_s12 }
  0x28   :  { %v43_v5 = vld [vmem:[#allocation2] sm:$0xff]  ;;  %v182_v6 = vpack.c.bf16 %v48_v4, %v47_v2  ;;  %v44_v7 = vld [vmem:[#allocation2 + $0x8] sm:$0xff]  ;;  %s235_s13 = scalar_lea.vmem %s146_s12, 256  ;;  %p240_p3 = scmp.lt.s32.totalorder %s146_s12, %s146_s12 }
  0x29   :  { %175 = vmatprep.mubr.msk.f32.mxu0 %vm56_vm0, %v43_v5  ;;  %179 = vmatprep.subr.bf16.mxu0 %v178_v3  ;;  %v158_v8 = vld [vmem:[%s338_s2] ss:$0 sm:$0xff]  ;;  %p236_p2 = scmp.ne.s32.totalorder %s146_s12, %s235_s13  ;;  %p241_p4 = scmp.lt.s32.totalorder %s235_s13, %s235_s13 }
  0x2a   :  { %181 = vmatpush3.bf16.msra.mxu0 %v178_v3 }
  0x2b   :  { %183 = vmatprep.subr.bf16.mxu0 %v182_v6  ;;  %p242_p5 = por %p241_p4, %p240_p3 }
  0x2d   :  { %p243_p6 = pnand %p242_p5, %p236_p2 }
  0x2e   :  { %185 = vmatpush3.bf16.msra.mxu0 %v182_v6 }
  0x31   :  { %176 = vmatmul.mubr.msk.f32.vlgmr.msra.gmra.mrb[0].mxu0 %vm56_vm0, %v44_v7 }
 0x104   :  { %v177_v9 = vpop.f32.mrb[0].mxu0 }
 0x105   :  { %v135_v10 = vadd.f32 %v177_v9, %v158_v8  ;;  %v129_v11 = vpop.f32.mrb[1].mxu0 }
 0x106   :  { %v130_v12 = vadd.f32 %v158_v8, %v129_v11 }
 0x107   :  { %139 = vst [vmem:[#allocation7 + $0x8] sm:$0xff] %v135_v10 }
 0x108   :  { %138 = vst [vmem:[#allocation7] sm:$0xff] %v130_v12 }
 0x109   :  { %246 = shalt.err (!%p243_p6)
}
 0x10a   :  { %s247_s2 = scalar_lea.hbm %s339_s3, 256 }
 0x10b   :  { %p248_p7 = scmp.ne.s32.totalorder %s339_s3, %s247_s2  ;;  %p251_p8 = scmp.lt.u32.totalorder %s247_s2, %s339_s3 }
 0x10d   :  { %p253_p9 = pnand %p251_p8, %p248_p7 }
 0x10f   :  { %256 = shalt.err (!%p253_p9)
}
 0x110   :  { %151 = dma.vmem_to_hbm [thread:$0]  %s146_s12, 256, %s339_s3, [#allocation4], %s264_s22, %s264_s22, %s265_s23  }
 0x111   :  { %261 = dma.done.wait [#allocation4], 256  }
 0x112   :  { %262 = vsyncadd [#allocation4], 4294967040 }
 0x113   :  { %155 = vsyncpa [#allocation3], 1 }
 0x114   :  { %156 = vsyncpa [#allocation6], 1 }
 0x115   :  { %157 = vsyncpa [#allocation4], 1 }

</bundles_post_ra>
